<compile_context>
chip_gen: v7x
topology: tpu7x:2x2x1
jax: 0.10.0
libtpu: 0.0.40
codegen_flags: <defaults>
</compile_context>

<pallas_src>
import jax
import jax.numpy as jnp
import numpy as np
from jax.experimental import pallas as pl
from jax.experimental.pallas import tpu as pltpu


def _mixup_kernel(perm_ref, x_ref, xsrc_ref, lam_ref, o_ref, gbuf, sems):
    # perm_ref : (B,) int32, SMEM (scalar prefetch).
    # x_ref    : (TB, R, L) VMEM block, rows [i*TB, (i+1)*TB) of x.
    # xsrc_ref : full (B, R, L) array left in HBM (memory_space=pl.ANY).
    # lam_ref  : (1, 1) f32 in SMEM.
    # o_ref    : (TB, R, L) output block.
    # gbuf     : (TB, R, L) VMEM scratch holding the gathered rows x[perm].
    # sems     : (TB,) DMA semaphores.
    i = pl.program_id(0)
    tb = x_ref.shape[0]
    base = i * tb

    # Issue all TB gather DMAs concurrently (random HBM rows), then wait.
    for r in range(tb):
        src = perm_ref[base + r]
        pltpu.make_async_copy(xsrc_ref.at[src], gbuf.at[r], sems.at[r]).start()
    for r in range(tb):
        pltpu.make_async_copy(xsrc_ref.at[0], gbuf.at[r], sems.at[r]).wait()

    lam = lam_ref[0, 0]
    xf = x_ref[...].astype(jnp.float32)
    gf = gbuf[...].astype(jnp.float32)
    o_ref[...] = (lam * xf + (1.0 - lam) * gf).astype(o_ref.dtype)


def mixup_pallas(x, perm, lam, block_rows=None):
    """mixed_x = lam * x + (1 - lam) * x[perm]   (x is NCHW)."""
    B, C, H, W = x.shape
    M = C * H * W

    # Lane/sublane-dense per-row view when possible; otherwise fall back to
    # the (C, H*W) view (correct, just sublane-sparse for small C).
    if M % 128 == 0:
        R, L = M // 128, 128
    else:
        R, L = C, H * W
    xr = x.reshape(B, R, L)

    itemsize = jnp.dtype(x.dtype).itemsize
    row_bytes = M * itemsize
    if block_rows is None:
        # Pipelined VMEM ~ 5 * TB * row_bytes (x in + out double-buffered, plus
        # the gather buffer).  Budget well under v7x's 64 MiB / 32 MiB scoped.
        budget = 12 * 1024 * 1024
        cap = max(1, min(64, budget // max(1, 5 * row_bytes)))
        tb = 1
        for d in range(1, min(cap, B) + 1):
            if B % d == 0:
                tb = d
    else:
        tb = int(block_rows)
        assert B % tb == 0, "block_rows must divide the batch size"
    grid = (B // tb,)

    lam2d = jnp.asarray(lam, jnp.float32).reshape(1, 1)
    perm = jnp.asarray(perm, jnp.int32)

    out = pl.pallas_call(
        _mixup_kernel,
        out_shape=jax.ShapeDtypeStruct((B, R, L), x.dtype),
        grid_spec=pltpu.PrefetchScalarGridSpec(
            num_scalar_prefetch=1,            # perm lands in SMEM first
            grid=grid,
            in_specs=[
                # x rows [i*TB, (i+1)*TB) — BlockSpec-pipelined.
                pl.BlockSpec((tb, R, L), lambda i, perm_s: (i, 0, 0)),
                # Same array, left in HBM; gathered rows fetched by manual DMA.
                pl.BlockSpec(memory_space=pl.ANY),
                # lam scalar, whole array in SMEM.
                pl.BlockSpec(memory_space=pltpu.MemorySpace.SMEM),
            ],
            out_specs=pl.BlockSpec((tb, R, L), lambda i, perm_s: (i, 0, 0)),
            scratch_shapes=[
                pltpu.VMEM((tb, R, L), x.dtype),
                pltpu.SemaphoreType.DMA((tb,)),
            ],
        ),
        compiler_params=pltpu.CompilerParams(
            dimension_semantics=("parallel",),
            vmem_limit_bytes=32 * 1024 * 1024,
        ),
    )(perm, xr, xr, lam2d)
    return out.reshape(B, C, H, W)


def random_mixup(x, p=0.5, alpha=0.4, rng=None):
    """Full RandomMixUp.forward semantics (host-side RNG, like the nn.Module)."""
    # TODO(synk): the Bernoulli(p)/Beta(alpha) draw and the Python branch are
    # host control flow (exactly as in the PyTorch module); for use inside a
    # jitted training step, hoist the draw out of the jit or use lax.cond.
    rng = np.random.default_rng(0) if rng is None else rng
    if rng.random() < p:
        lam = float(rng.beta(alpha, alpha))
        perm = jnp.asarray(rng.permutation(x.shape[0]), dtype=jnp.int32)
        return mixup_pallas(x, perm, lam)
    return x


if __name__ == "__main__":
    key = jax.random.PRNGKey(0)
    kx, klam, kperm, kx2 = jax.random.split(key, 4)

    # Primary test: shapes implied by the module usage.
    B, C, H, W = 2, 4, 16, 16
    x = jax.random.normal(kx, (B, C, H, W), dtype=jnp.float32)
    lam = float(jax.random.beta(klam, 0.4, 0.4))
    perm = jax.random.permutation(kperm, B).astype(jnp.int32)

    out = jax.block_until_ready(mixup_pallas(x, perm, lam))
    ref = lam * x + (1.0 - lam) * x[perm]
    assert out.shape == x.shape and out.dtype == x.dtype
    assert jnp.allclose(out, ref, atol=1e-6, rtol=1e-6), "f32 mismatch vs reference"

    # bf16 + multi-block grid path (block_rows=2 forces grid > 1 and a gather
    # that crosses block boundaries).
    B2 = 4
    x2 = jax.random.normal(kx2, (B2, C, H, W), dtype=jnp.float32).astype(jnp.bfloat16)
    perm2 = jax.random.permutation(jax.random.PRNGKey(3), B2).astype(jnp.int32)
    lam2 = 0.3
    out2 = jax.block_until_ready(mixup_pallas(x2, perm2, lam2, block_rows=2))
    ref2 = (lam2 * x2.astype(jnp.float32)
            + (1.0 - lam2) * x2.astype(jnp.float32)[perm2]).astype(jnp.bfloat16)
    assert out2.shape == x2.shape and out2.dtype == jnp.bfloat16
    assert jnp.allclose(out2.astype(jnp.float32), ref2.astype(jnp.float32),
                        atol=1e-2, rtol=1e-2), "bf16 mismatch vs reference"

    # Full module path (p=1.0 so the mixup branch is taken).
    out3 = jax.block_until_ready(random_mixup(x, p=1.0, rng=np.random.default_rng(1)))
    assert out3.shape == x.shape

    print("KERNEL_OK")
</pallas_src>

<mosaic_0001>
module attributes {stable_mosaic.version = 11 : i64} {
  func.func @_mixup_kernel(%arg0: i32, %arg1: memref<2xi32, #tpu.memory_space<smem>>, %arg2: memref<2x8x128xf32, #tpu.memory_space<vmem>>, %arg3: memref<2x8x128xf32, #tpu.memory_space<any>>, %arg4: memref<1x1xf32, #tpu.memory_space<smem>>, %arg5: memref<2x8x128xf32, #tpu.memory_space<vmem>>, %arg6: memref<2x8x128xf32, #tpu.memory_space<vmem>>, %arg7: memref<2x!tpu.dma_semaphore, #tpu.memory_space<semaphore_mem>>) attributes {dimension_semantics = [#tpu.dimension_semantics<parallel>], iteration_bounds = array<i64: 1>, scalar_prefetch = 1 : i64, scratch_operands = 2 : i64, tpu.core_type = #tpu.core_type<tc>, window_params = [{transform_indices = @transform_0, window_bounds = array<i64: 2, 8, 128>}, {}, {transform_indices = @transform_2, window_bounds = array<i64: 1, 1>}, {transform_indices = @transform_3, window_bounds = array<i64: 2, 8, 128>}]} {
    %c2_i32 = arith.constant 2 : i32
    %0 = arith.muli %arg0, %c2_i32 : i32
    %c0_i32 = arith.constant 0 : i32
    %1 = arith.addi %0, %c0_i32 : i32
    %2 = arith.index_cast %1 : i32 to index
    %3 = memref.load %arg1[%2] : memref<2xi32, #tpu.memory_space<smem>>
    %c0_i32_0 = arith.constant 0 : i32
    %c0_i32_1 = arith.constant 0 : i32
    %c0_i32_2 = arith.constant 0 : i32
    %c0_i32_3 = arith.constant 0 : i32
    %4 = tpu.memref_slice %arg3[%3, %c0_i32_2, %c0_i32_3] : memref<2x8x128xf32, #tpu.memory_space<any>> -> memref<1x8x128xf32, #tpu.memory_space<any>>
    %5 = tpu.memref_squeeze %4 : memref<1x8x128xf32, #tpu.memory_space<any>> -> memref<8x128xf32, #tpu.memory_space<any>>
    %c0_i32_4 = arith.constant 0 : i32
    %c0_i32_5 = arith.constant 0 : i32
    %6 = tpu.memref_slice %arg6[%c0_i32_0, %c0_i32_4, %c0_i32_5] : memref<2x8x128xf32, #tpu.memory_space<vmem>> -> memref<1x8x128xf32, #tpu.memory_space<vmem>>
    %7 = tpu.memref_squeeze %6 : memref<1x8x128xf32, #tpu.memory_space<vmem>> -> memref<8x128xf32, #tpu.memory_space<vmem>>
    %8 = tpu.memref_slice %arg7[%c0_i32_1] : memref<2x!tpu.dma_semaphore, #tpu.memory_space<semaphore_mem>> -> memref<1x!tpu.dma_semaphore, #tpu.memory_space<semaphore_mem>>
    %9 = tpu.memref_squeeze %8 : memref<1x!tpu.dma_semaphore, #tpu.memory_space<semaphore_mem>> -> memref<!tpu.dma_semaphore, #tpu.memory_space<semaphore_mem>>
    tpu.enqueue_dma source(%5 : memref<8x128xf32, #tpu.memory_space<any>>) target(%7 : memref<8x128xf32, #tpu.memory_space<vmem>>) target_semaphore(%9 : memref<!tpu.dma_semaphore, #tpu.memory_space<semaphore_mem>>)
    %c1_i32 = arith.constant 1 : i32
    %10 = arith.addi %0, %c1_i32 : i32
    %11 = arith.index_cast %10 : i32 to index
    %12 = memref.load %arg1[%11] : memref<2xi32, #tpu.memory_space<smem>>
    %c1_i32_6 = arith.constant 1 : i32
    %c1_i32_7 = arith.constant 1 : i32
    %c0_i32_8 = arith.constant 0 : i32
    %c0_i32_9 = arith.constant 0 : i32
    %13 = tpu.memref_slice %arg3[%12, %c0_i32_8, %c0_i32_9] : memref<2x8x128xf32, #tpu.memory_space<any>> -> memref<1x8x128xf32, #tpu.memory_space<any>>
    %14 = tpu.memref_squeeze %13 : memref<1x8x128xf32, #tpu.memory_space<any>> -> memref<8x128xf32, #tpu.memory_space<any>>
    %c0_i32_10 = arith.constant 0 : i32
    %c0_i32_11 = arith.constant 0 : i32
    %15 = tpu.memref_slice %arg6[%c1_i32_6, %c0_i32_10, %c0_i32_11] : memref<2x8x128xf32, #tpu.memory_space<vmem>> -> memref<1x8x128xf32, #tpu.memory_space<vmem>>
    %16 = tpu.memref_squeeze %15 : memref<1x8x128xf32, #tpu.memory_space<vmem>> -> memref<8x128xf32, #tpu.memory_space<vmem>>
    %17 = tpu.memref_slice %arg7[%c1_i32_7] : memref<2x!tpu.dma_semaphore, #tpu.memory_space<semaphore_mem>> -> memref<1x!tpu.dma_semaphore, #tpu.memory_space<semaphore_mem>>
    %18 = tpu.memref_squeeze %17 : memref<1x!tpu.dma_semaphore, #tpu.memory_space<semaphore_mem>> -> memref<!tpu.dma_semaphore, #tpu.memory_space<semaphore_mem>>
    tpu.enqueue_dma source(%14 : memref<8x128xf32, #tpu.memory_space<any>>) target(%16 : memref<8x128xf32, #tpu.memory_space<vmem>>) target_semaphore(%18 : memref<!tpu.dma_semaphore, #tpu.memory_space<semaphore_mem>>)
    %c0_i32_12 = arith.constant 0 : i32
    %c0_i32_13 = arith.constant 0 : i32
    %c0_i32_14 = arith.constant 0 : i32
    %c0_i32_15 = arith.constant 0 : i32
    %c0_i32_16 = arith.constant 0 : i32
    %19 = tpu.memref_slice %arg3[%c0_i32_12, %c0_i32_15, %c0_i32_16] : memref<2x8x128xf32, #tpu.memory_space<any>> -> memref<1x8x128xf32, #tpu.memory_space<any>>
    %20 = tpu.memref_squeeze %19 : memref<1x8x128xf32, #tpu.memory_space<any>> -> memref<8x128xf32, #tpu.memory_space<any>>
    %c0_i32_17 = arith.constant 0 : i32
    %c0_i32_18 = arith.constant 0 : i32
    %21 = tpu.memref_slice %arg6[%c0_i32_13, %c0_i32_17, %c0_i32_18] : memref<2x8x128xf32, #tpu.memory_space<vmem>> -> memref<1x8x128xf32, #tpu.memory_space<vmem>>
    %22 = tpu.memref_squeeze %21 : memref<1x8x128xf32, #tpu.memory_space<vmem>> -> memref<8x128xf32, #tpu.memory_space<vmem>>
    %23 = tpu.memref_slice %arg7[%c0_i32_14] : memref<2x!tpu.dma_semaphore, #tpu.memory_space<semaphore_mem>> -> memref<1x!tpu.dma_semaphore, #tpu.memory_space<semaphore_mem>>
    %24 = tpu.memref_squeeze %23 : memref<1x!tpu.dma_semaphore, #tpu.memory_space<semaphore_mem>> -> memref<!tpu.dma_semaphore, #tpu.memory_space<semaphore_mem>>
    tpu.wait_dma2 semaphore(%24 : memref<!tpu.dma_semaphore, #tpu.memory_space<semaphore_mem>>) src(%20 : memref<8x128xf32, #tpu.memory_space<any>>) dst(%22 : memref<8x128xf32, #tpu.memory_space<vmem>>)
    %c0_i32_19 = arith.constant 0 : i32
    %c1_i32_20 = arith.constant 1 : i32
    %c1_i32_21 = arith.constant 1 : i32
    %c0_i32_22 = arith.constant 0 : i32
    %c0_i32_23 = arith.constant 0 : i32
    %25 = tpu.memref_slice %arg3[%c0_i32_19, %c0_i32_22, %c0_i32_23] : memref<2x8x128xf32, #tpu.memory_space<any>> -> memref<1x8x128xf32, #tpu.memory_space<any>>
    %26 = tpu.memref_squeeze %25 : memref<1x8x128xf32, #tpu.memory_space<any>> -> memref<8x128xf32, #tpu.memory_space<any>>
    %c0_i32_24 = arith.constant 0 : i32
    %c0_i32_25 = arith.constant 0 : i32
    %27 = tpu.memref_slice %arg6[%c1_i32_20, %c0_i32_24, %c0_i32_25] : memref<2x8x128xf32, #tpu.memory_space<vmem>> -> memref<1x8x128xf32, #tpu.memory_space<vmem>>
    %28 = tpu.memref_squeeze %27 : memref<1x8x128xf32, #tpu.memory_space<vmem>> -> memref<8x128xf32, #tpu.memory_space<vmem>>
    %29 = tpu.memref_slice %arg7[%c1_i32_21] : memref<2x!tpu.dma_semaphore, #tpu.memory_space<semaphore_mem>> -> memref<1x!tpu.dma_semaphore, #tpu.memory_space<semaphore_mem>>
    %30 = tpu.memref_squeeze %29 : memref<1x!tpu.dma_semaphore, #tpu.memory_space<semaphore_mem>> -> memref<!tpu.dma_semaphore, #tpu.memory_space<semaphore_mem>>
    tpu.wait_dma2 semaphore(%30 : memref<!tpu.dma_semaphore, #tpu.memory_space<semaphore_mem>>) src(%26 : memref<8x128xf32, #tpu.memory_space<any>>) dst(%28 : memref<8x128xf32, #tpu.memory_space<vmem>>)
    %c0 = arith.constant 0 : index
    %c0_26 = arith.constant 0 : index
    %31 = memref.load %arg4[%c0, %c0_26] : memref<1x1xf32, #tpu.memory_space<smem>>
    %c0_27 = arith.constant 0 : index
    %c0_28 = arith.constant 0 : index
    %c0_29 = arith.constant 0 : index
    %32 = vector.load %arg2[%c0_27, %c0_28, %c0_29] : memref<2x8x128xf32, #tpu.memory_space<vmem>>, vector<2x8x128xf32>
    %c0_30 = arith.constant 0 : index
    %c0_31 = arith.constant 0 : index
    %c0_32 = arith.constant 0 : index
    %33 = vector.load %arg6[%c0_30, %c0_31, %c0_32] : memref<2x8x128xf32, #tpu.memory_space<vmem>>, vector<2x8x128xf32>
    %34 = vector.broadcast %31 : f32 to vector<2x8x128xf32>
    %35 = arith.mulf %34, %32 : vector<2x8x128xf32>
    %cst = arith.constant 1.000000e+00 : f32
    %36 = arith.subf %cst, %31 : f32
    %37 = vector.broadcast %36 : f32 to vector<2x8x128xf32>
    %38 = arith.mulf %37, %33 : vector<2x8x128xf32>
    %39 = arith.addf %35, %38 : vector<2x8x128xf32>
    %c0_33 = arith.constant 0 : index
    %c0_34 = arith.constant 0 : index
    %c0_35 = arith.constant 0 : index
    %40 = vector.load %arg5[%c0_33, %c0_34, %c0_35] : memref<2x8x128xf32, #tpu.memory_space<vmem>>, vector<2x8x128xf32>
    tpu.vector_store %arg5[%c0_33, %c0_34, %c0_35], %39 {strides = array<i32>} : memref<2x8x128xf32, #tpu.memory_space<vmem>>, vector<2x8x128xf32>,
    return
  }
  func.func @transform_0(%arg0: i32, %arg1: memref<2xi32, #tpu.memory_space<smem>>) -> (i32, i32, i32) {
    %c0_i32 = arith.constant 0 : i32
    %c0_i32_0 = arith.constant 0 : i32
    %c0_i32_1 = arith.constant 0 : i32
    return %arg0, %c0_i32, %c0_i32_0 : i32, i32, i32
  }
  func.func @transform_2(%arg0: i32, %arg1: memref<2xi32, #tpu.memory_space<smem>>) -> (i32, i32) {
    %c0_i32 = arith.constant 0 : i32
    %c0_i32_0 = arith.constant 0 : i32
    %c0_i32_1 = arith.constant 0 : i32
    return %c0_i32, %c0_i32_0 : i32, i32
  }
  func.func @transform_3(%arg0: i32, %arg1: memref<2xi32, #tpu.memory_space<smem>>) -> (i32, i32, i32) {
    %c0_i32 = arith.constant 0 : i32
    %c0_i32_0 = arith.constant 0 : i32
    %c0_i32_1 = arith.constant 0 : i32
    return %arg0, %c0_i32, %c0_i32_0 : i32, i32, i32
  }
}

</mosaic_0001>

<bundles_post_ra>
// kernel: tpu_custom_call.1
= control target key start
LH: loop header
LB: loop body
LE: loop exit
PB: predicated region body
PF: predicated region fallthrough
CT: control target
= control target key end

     0   :  { %s362_s0 = inlined_call_operand.vmem [shape: s32[2], index: 0, kind: input, shape index: {}]   ;;  %s363_s1 = inlined_call_operand.hbm [shape: f32[2,8,128], index: 1, kind: input, shape index: {}]   ;;  %s364_s2 = inlined_call_operand.hbm [shape: f32[2,8,128], index: 2, kind: input, shape index: {}]   ;;  %s365_s3 = inlined_call_operand.<no memory space> [shape: f32[1,1], index: 3, kind: input, shape index: {}]   ;;  %s366_s4 = inlined_call_operand.hbm [shape: f32[2,8,128], index: 4, kind: output, shape index: {}]  }
   0x1   :  { %s9_s17 = sshll.u32 %s362_s0, 4  ;;  %s10_s17 = int_to_ptr.vmem [resolvable:$true] %s9_s17 }
   0x2   :  { %s140_s18 = scalar_lea.vmem %s10_s17, 16  ;;  %p145_p1 = scmp.lt.s32.totalorder %s10_s17, %s10_s17 }
   0x3   :  { %p141_p0 = scmp.ne.s32.totalorder %s10_s17, %s140_s18  ;;  %p146_p2 = scmp.lt.s32.totalorder %s140_s18, %s140_s18 }
   0x5   :  { %p147_p3 = por %p146_p2, %p145_p1 }
   0x7   :  { %p148_p4 = pnand %p147_p3, %p141_p0 }
   0x9   :  { %151 = shalt.err (!%p148_p4)  }
   0xa   :  { %s254_s19 = smov [#allocation5]  }
   0xb   :  { %12 = dma.vmem_to_smem %s10_s17, 16, %s254_s19, [#allocation4] }
   0xc   :  { %244 = dma.done.wait [#allocation4], 16 }
   0xd   :  { %245 = vsyncadd [#allocation4], 4294967280 }
   0xe   :  { %15 = sfence }
   0xf   :  { %16 = vsyncpa [#allocation8], 0 }
  0x10   :  { %17 = vsyncpa [#allocation9], 0  ;;  %s255_s20 = smov [#allocation7]   ;;  %s152_s23 = scalar_lea.hbm %s363_s1, 256 }
  0x11   :  { %s23_s21 = sshll.u32 %s255_s20, 4  ;;  %p153_p5 = scmp.ne.s32.totalorder %s363_s1, %s152_s23  ;;  %s24_s21 = int_to_ptr.vmem [resolvable:$true] %s23_s21 }
  0x12   :  { %p156_p6 = scmp.lt.u32.totalorder %s152_s23, %s363_s1 }
  0x14   :  { %p158_p7 = pnand %p156_p6, %p153_p5 }
  0x16   :  { %161 = shalt.err (!%p158_p7)
}
  0x17   :  { %s162_s28 = scalar_lea.vmem %s24_s21, 256  ;;  %p167_p9 = scmp.lt.s32.totalorder %s24_s21, %s24_s21 }
  0x18   :  { %p163_p8 = scmp.ne.s32.totalorder %s24_s21, %s162_s28  ;;  %p168_p10 = scmp.lt.s32.totalorder %s162_s28, %s162_s28 }
  0x1a   :  { %p169_p11 = por %p168_p10, %p167_p9 }
  0x1c   :  { %p170_p12 = pnand %p169_p11, %p163_p8 }
  0x1e   :  { %173 = shalt.err (!%p170_p12)
}
  0x1f   :  { %s256_s29 = smov 128   ;;  %s257_s30 = smov 8  }
  0x20   :  { %29 = dma.hbm_to_vmem [thread:$0]  %s363_s1, 256, %s24_s21, [#allocation8], %s256_s29, %s256_s29, %s257_s30  }
  0x21   :  { %246 = dma.done.wait [#allocation8], 256  }
  0x22   :  { %247 = vsyncadd [#allocation8], 4294967040  ;;  %s126_s7 = sld [smem:[#allocation5 + $0x1]]  ;;  %s36_s8 = sld [smem:[#allocation5]] }
  0x23   :  { %s258_s9 = smov [#allocation2]   ;;  %s259_s11 = smov [#allocation2 + $0x8]  }
  0x24   :  { %s47_s10 = sshll.u32 %s258_s9, 4  ;;  %s65_s12 = sshll.u32 %s259_s11, 4  ;;  %s304_s10 = int_to_ptr.vmem [resolvable:$true] %s47_s10  ;;  %s306_s12 = int_to_ptr.vmem [resolvable:$true] %s65_s12 }
  0x25   :  { %s176_s0 = scalar_lea.hbm %s364_s2, 256 }
  0x28   :  { %s131_s13 = sshll.u32 %s36_s8, 7  ;;  %s132_s14 = sshll.u32 %s126_s7, 7 }
  0x29   :  { %s39_s17 = scalar_lea.hbm %s364_s2, %s131_s13  ;;  %s314_s19 = scalar_lea.hbm %s364_s2, %s132_s14 }
  0x2a   :  { %s174_s20 = scalar_lea.hbm %s39_s17, 128  ;;  %p177_p0 = scmp.lt.u32.totalorder %s39_s17, %s364_s2 }
  0x2b   :  { %p175_p13 = scmp.ne.s32.totalorder %s39_s17, %s174_s20  ;;  %p178_p1 = scmp.lt.u32.totalorder %s176_s0, %s174_s20 }
  0x2c   :  { %p180_p3 = scmp.lt.u32.totalorder %s174_s20, %s39_s17 }
  0x2d   :  { %p179_p2 = por %p178_p1, %p177_p0 }
  0x2f   :  { %p181_p4 = por %p180_p3, %p179_p2 }
  0x31   :  { %p182_p5 = pnand %p181_p4, %p175_p13 }
  0x33   :  { %185 = shalt.err (!%p182_p5)  }
  0x34   :  { %s186_s25 = scalar_lea.vmem %s304_s10, 128  ;;  %s190_s26 = scalar_lea.vmem %s304_s10, 256 }
  0x35   :  { %p187_p6 = scmp.ne.s32.totalorder %s304_s10, %s186_s25  ;;  %p191_p7 = scmp.lt.s32.totalorder %s304_s10, %s304_s10 }
  0x36   :  { %p192_p8 = scmp.lt.s32.totalorder %s190_s26, %s186_s25 }
  0x38   :  { %p193_p9 = por %p192_p8, %p191_p7 }
  0x3a   :  { %p194_p10 = pnand %p193_p9, %p187_p6 }
  0x3c   :  { %197 = shalt.err (!%p194_p10)  }
  0x3d   :  { %50 = dma.hbm_to_vmem [thread:$0]  %s39_s17, 128, %s304_s10, [#allocation3] }
  0x3e   :  { %s198_s27 = scalar_lea.hbm %s314_s19, 128  ;;  %p201_p12 = scmp.lt.u32.totalorder %s314_s19, %s364_s2 }
  0x3f   :  { %p199_p11 = scmp.ne.s32.totalorder %s314_s19, %s198_s27  ;;  %p202_p13 = scmp.lt.u32.totalorder %s176_s0, %s198_s27 }
  0x40   :  { %p204_p1 = scmp.lt.u32.totalorder %s198_s27, %s314_s19 }
  0x41   :  { %p203_p0 = por %p202_p13, %p201_p12 }
  0x43   :  { %p205_p2 = por %p204_p1, %p203_p0 }
  0x45   :  { %p206_p3 = pnand %p205_p2, %p199_p11 }
  0x47   :  { %209 = shalt.err (!%p206_p3)  }
  0x48   :  { %s210_s6 = scalar_lea.vmem %s306_s12, 128  ;;  %p215_p5 = scmp.lt.s32.totalorder %s306_s12, %s304_s10 }
  0x49   :  { %p211_p4 = scmp.ne.s32.totalorder %s306_s12, %s210_s6  ;;  %p216_p6 = scmp.lt.s32.totalorder %s190_s26, %s210_s6 }
  0x4b   :  { %p217_p7 = por %p216_p6, %p215_p5 }
  0x4d   :  { %p218_p8 = pnand %p217_p7, %p211_p4 }
  0x4f   :  { %221 = shalt.err (!%p218_p8)  }
  0x50   :  { %68 = dma.hbm_to_vmem [thread:$0]  %s314_s19, 128, %s306_s12, [#allocation3 + $0x1] }
  0x51   :  { %248 = dma.done.wait [#allocation3], 128 }
  0x52   :  { %249 = vsyncadd [#allocation3], 4294967168 }
  0x53   :  { %250 = dma.done.wait [#allocation3 + $0x1], 128 }
  0x54   :  { %251 = vsyncadd [#allocation3 + $0x1], 4294967168  ;;  %s82_s8 = ssub.f32 1.0, %s365_s3  ;;  %v79_v0 = vstv %s365_s3  ;;  %v75_v2 = vld [vmem:[#allocation7] sm:$0xff]  ;;  %v77_v3 = vld [vmem:[#allocation2] sm:$0xff]  ;;  %s260_s10 = smov [#allocation10]  }
  0x55   :  { %v76_v4 = vld [vmem:[#allocation7 + $0x8] sm:$0xff]  ;;  %v80_v5 = vmul.f32 %v79_v0, %v75_v2  ;;  %v78_v7 = vld [vmem:[#allocation2 + $0x8] sm:$0xff]  ;;  %s95_s12 = sshll.u32 %s260_s10, 4  ;;  %s96_s12 = int_to_ptr.vmem [resolvable:$true] %s95_s12 }
  0x56   :  { %v83_v1 = vstv %s82_s8  ;;  %v81_v8 = vmul.f32 %v79_v0, %v76_v4  ;;  %s222_s13 = scalar_lea.vmem %s96_s12, 256  ;;  %p227_p10 = scmp.lt.s32.totalorder %s96_s12, %s96_s12 }
  0x57   :  { %v84_v6 = vmul.f32 %v83_v1, %v77_v3  ;;  %v85_v9 = vmul.f32 %v83_v1, %v78_v7  ;;  %p223_p9 = scmp.ne.s32.totalorder %s96_s12, %s222_s13  ;;  %p228_p11 = scmp.lt.s32.totalorder %s222_s13, %s222_s13 }
  0x59   :  { %v86_v10 = vadd.f32 %v84_v6, %v80_v5  ;;  %v87_v11 = vadd.f32 %v85_v9, %v81_v8  ;;  %p229_p12 = por %p228_p11, %p227_p10 }
  0x5b   :  { %88 = vst [vmem:[#allocation10] sm:$0xff] %v86_v10  ;;  %89 = vst [vmem:[#allocation10 + $0x8] sm:$0xff] %v87_v11  ;;  %p230_p13 = pnand %p229_p12, %p223_p9 }
  0x5d   :  { %233 = shalt.err (!%p230_p13)
}
  0x5e   :  { %s234_s15 = scalar_lea.hbm %s366_s4, 256 }
  0x5f   :  { %p235_p0 = scmp.ne.s32.totalorder %s366_s4, %s234_s15  ;;  %p238_p1 = scmp.lt.u32.totalorder %s234_s15, %s366_s4 }
  0x61   :  { %p240_p2 = pnand %p238_p1, %p235_p0 }
  0x63   :  { %243 = shalt.err (!%p240_p2)
}
  0x64   :  { %101 = dma.vmem_to_hbm [thread:$0]  %s96_s12, 256, %s366_s4, [#allocation9], %s256_s29, %s256_s29, %s257_s30  }
  0x65   :  { %252 = dma.done.wait [#allocation9], 256  }
  0x66   :  { %253 = vsyncadd [#allocation9], 4294967040 }
  0x67   :  { %105 = vsyncpa [#allocation8], 1 }
  0x68   :  { %106 = vsyncpa [#allocation9], 1 }
  0x69   :  { %107 = vsyncmov [#allocation3] }
  0x6c   :  { %s108_s21 = vpop.sfrf %107 }
  0x6d   :  { %p129_p3 = scmp.ne.s32.totalorder %s108_s21, 0 }
  0x6f   :  { %112 = shalt.err (%p129_p3)  }
  0x70   :  { %114 = vsyncmov [#allocation3 + $0x1] }
  0x73   :  { %s115_s22 = vpop.sfrf %114 }
  0x74   :  { %p130_p4 = scmp.ne.s32.totalorder %s115_s22, 0 }
  0x76   :  { %119 = shalt.err (%p130_p4)  }

</bundles_post_ra>
